<compile_context>
chip_gen: v7x
topology: tpu7x:2x2x1
jax: 0.10.0
libtpu: 0.0.40
codegen_flags: <defaults>
</compile_context>

<pallas_src>
import functools

import jax
import jax.numpy as jnp
from jax import lax
from jax.experimental import pallas as pl
from jax.experimental.pallas import tpu as pltpu


_CHUNK = 256  # inner row-chunk; intermediates stay < ~0.5 MiB even lane-padded


def _mlp_kernel(x_ref, w1_ref, b1_ref, w2_ref, b2_ref, w3_ref, b3_ref, o_ref,
                *, chunk):
    """One batch tile, processed in row chunks so h1/h2 never exist at tile size."""
    # Weights/biases are tiny and VMEM-resident (constant index_map): load once.
    w1 = w1_ref[...]
    b1 = b1_ref[...]
    w2 = w2_ref[...]
    b2 = b2_ref[...]
    w3 = w3_ref[...]
    b3 = b3_ref[...]

    tile_b = x_ref.shape[0]
    n_chunks = tile_b // chunk  # static; wrapper guarantees divisibility

    def body(c, carry):
        r0 = pl.multiple_of(c * chunk, chunk)
        # x is f32 in HBM/VMEM; cast to bf16 right before the MXU (native rate,
        # f32 accumulation via preferred_element_type).
        x = x_ref[pl.ds(r0, chunk), :].astype(jnp.bfloat16)

        h1 = jnp.dot(x, w1, preferred_element_type=jnp.float32)
        h1 = jnp.maximum(h1 + b1, 0.0).astype(jnp.bfloat16)

        h2 = jnp.dot(h1, w2, preferred_element_type=jnp.float32)
        h2 = jnp.maximum(h2 + b2, 0.0).astype(jnp.bfloat16)

        out = jnp.dot(h2, w3, preferred_element_type=jnp.float32) + b3
        o_ref[pl.ds(r0, chunk), :] = out.astype(o_ref.dtype)
        return carry

    lax.fori_loop(0, n_chunks, body, 0, unroll=n_chunks <= 8)


def _choose_tile_b(B):
    """Batch-tile sizing with a *padded* VMEM budget.

    Everything here is lane-padded to 128, so per row the pallas_call-level
    buffers cost ~2 KiB (x f32 x2 bufs + out f32 x2 bufs); chunked intermediates
    add <1 MiB total.  tile_b=2048 => ~4-5 MiB: inside v5e's 16 MiB default
    scoped VMEM and v7x's 64 MiB physical VMEM, while keeping >=512 rows per DMA
    (~HBM roofline) and >=8 grid steps on big batches for pipelining / dual-TC.
    """
    if B <= _CHUNK:
        return B                                    # single full-extent block
    tile = min(2048, -(-B // 8))                    # aim for >= 8 grid steps
    tile = max(_CHUNK, (tile // _CHUNK) * _CHUNK)   # multiple of the chunk size
    return tile


@functools.partial(jax.jit, static_argnames=("tile_b",))
def feedforward_nn(x, params, *, tile_b=None):
    """Pallas TPU forward pass of FeedforwardNN.

    x:      (B, D_in) float32
    params: dict with w1 (D_in,64), b1 (64,), w2 (64,32), b2 (32,),
            w3 (32,D_out), b3 (D_out,)  (weights stored transposed vs torch).
    Returns (B, D_out) float32.
    """
    B, D_in = x.shape
    H1 = params["w1"].shape[1]
    H2 = params["w2"].shape[1]
    D_out = params["w3"].shape[1]

    if tile_b is None:
        tile_b = _choose_tile_b(B)
    tile_b = int(min(tile_b, B))
    # (8,128) block rule for the f32 x / out blocks: second-to-last dim must be
    # a multiple of 8 unless it spans the whole array (x stays f32 in the block,
    # so 8 -- not 16 -- is the right granularity).
    assert tile_b == B or tile_b % 8 == 0, \
        "tile_b must be a multiple of 8 (or equal the full batch)"

    chunk = _CHUNK if tile_b % _CHUNK == 0 else tile_b  # chunk divides tile_b

    # Tiny weights: one-off bf16 cast; biases stay f32 (added post-accumulation).
    w1 = params["w1"].astype(jnp.bfloat16)
    w2 = params["w2"].astype(jnp.bfloat16)
    w3 = params["w3"].astype(jnp.bfloat16)
    b1 = params["b1"].reshape(1, H1).astype(jnp.float32)
    b2 = params["b2"].reshape(1, H2).astype(jnp.float32)
    b3 = params["b3"].reshape(1, D_out).astype(jnp.float32)

    grid = (pl.cdiv(B, tile_b),)  # ragged last tile: OOB reads masked on writeback

    flops = 2 * B * (D_in * H1 + H1 * H2 + H2 * D_out)
    bytes_accessed = (B * D_in * 4 + B * D_out * 4
                      + 2 * (D_in * H1 + H1 * H2 + H2 * D_out)
                      + 4 * (H1 + H2 + D_out))

    out = pl.pallas_call(
        functools.partial(_mlp_kernel, chunk=chunk),
        out_shape=jax.ShapeDtypeStruct((B, D_out), jnp.float32),
        grid_spec=pltpu.PrefetchScalarGridSpec(
            num_scalar_prefetch=0,
            grid=grid,
            in_specs=[
                pl.BlockSpec((tile_b, D_in), lambda i: (i, 0)),   # x f32 (streams)
                pl.BlockSpec((D_in, H1), lambda i: (0, 0)),       # w1 (resident)
                pl.BlockSpec((1, H1), lambda i: (0, 0)),          # b1
                pl.BlockSpec((H1, H2), lambda i: (0, 0)),         # w2
                pl.BlockSpec((1, H2), lambda i: (0, 0)),          # b2
                pl.BlockSpec((H2, D_out), lambda i: (0, 0)),      # w3
                pl.BlockSpec((1, D_out), lambda i: (0, 0)),       # b3
            ],
            out_specs=pl.BlockSpec((tile_b, D_out), lambda i: (i, 0)),
        ),
        compiler_params=pltpu.CompilerParams(
            dimension_semantics=("parallel",),
        ),
        cost_estimate=pl.CostEstimate(
            flops=flops, transcendentals=0, bytes_accessed=bytes_accessed),
    )(x.astype(jnp.float32), w1, b1, w2, b2, w3, b3)

    return out


def init_params(key, input_dim, output_dim):
    """Deterministic synthetic init matching nn.Linear shapes.

    PyTorch nn.Linear stores weight as (out, in); we store the transpose
    (in, out) so the kernel computes x @ W + b directly.
    """
    k1, k2, k3, k4, k5, k6 = jax.random.split(key, 6)

    def linear(kw, kb, fan_in, fan_out):
        bound = 1.0 / jnp.sqrt(fan_in)
        w = jax.random.uniform(kw, (fan_in, fan_out), jnp.float32, -bound, bound)
        b = jax.random.uniform(kb, (fan_out,), jnp.float32, -bound, bound)
        return w, b

    w1, b1 = linear(k1, k2, input_dim, 64)
    w2, b2 = linear(k3, k4, 64, 32)
    w3, b3 = linear(k5, k6, 32, output_dim)
    return dict(w1=w1, b1=b1, w2=w2, b2=b2, w3=w3, b3=b3)


def reference_forward(x, p):
    """Pure-JAX f32 reference (matches the PyTorch module's forward)."""
    h1 = jnp.maximum(x @ p["w1"] + p["b1"], 0.0)
    h2 = jnp.maximum(h1 @ p["w2"] + p["b2"], 0.0)
    return h2 @ p["w3"] + p["b3"]


if __name__ == "__main__":
    key = jax.random.PRNGKey(0)
    k_params, k_x, k_x2, k_x3 = jax.random.split(key, 4)

    input_dim, output_dim = 16, 4
    params = init_params(k_params, input_dim, output_dim)

    # 1) Tiny batch: single full-extent block, grid=(1,).
    x = jax.random.normal(k_x, (8, input_dim), jnp.float32)
    out = jax.block_until_ready(feedforward_nn(x, params))
    ref = reference_forward(x, params)
    assert out.shape == (8, output_dim)
    # bf16 MXU operands with f32 accumulation -> looser tolerance vs f32 ref.
    assert jnp.allclose(out, ref, atol=3e-2, rtol=3e-2), "small-batch mismatch"

    # 2) Multi-step grid with a ragged last tile (B=70, tile_b=16 -> grid=(5,)).
    x2 = jax.random.normal(k_x2, (70, input_dim), jnp.float32)
    out2 = jax.block_until_ready(feedforward_nn(x2, params, tile_b=16))
    ref2 = reference_forward(x2, params)
    assert out2.shape == (70, output_dim)
    assert jnp.allclose(out2, ref2, atol=3e-2, rtol=3e-2), "tiled-batch mismatch"

    # 3) Exercises the inner row-chunk loop (tile_b=512 -> 2 chunks of 256)
    #    plus a ragged 8-row last tile.
    x3 = jax.random.normal(k_x3, (520, input_dim), jnp.float32)
    out3 = jax.block_until_ready(feedforward_nn(x3, params, tile_b=512))
    ref3 = reference_forward(x3, params)
    assert out3.shape == (520, output_dim)
    assert jnp.allclose(out3, ref3, atol=3e-2, rtol=3e-2), "chunked-tile mismatch"

    print("KERNEL_OK")
</pallas_src>

<mosaic_0001>
module attributes {stable_mosaic.version = 11 : i64} {
  func.func @_mlp_kernel(%arg0: i32, %arg1: memref<8x16xf32, #tpu.memory_space<vmem>>, %arg2: memref<16x64xbf16, #tpu.memory_space<vmem>>, %arg3: memref<1x64xf32, #tpu.memory_space<vmem>>, %arg4: memref<64x32xbf16, #tpu.memory_space<vmem>>, %arg5: memref<1x32xf32, #tpu.memory_space<vmem>>, %arg6: memref<32x4xbf16, #tpu.memory_space<vmem>>, %arg7: memref<1x4xf32, #tpu.memory_space<vmem>>, %arg8: memref<8x4xf32, #tpu.memory_space<vmem>>) attributes {dimension_semantics = [#tpu.dimension_semantics<parallel>], iteration_bounds = array<i64: 1>, scalar_prefetch = 0 : i64, scratch_operands = 0 : i64, tpu.core_type = #tpu.core_type<tc>, window_params = [{transform_indices = @transform_0, window_bounds = array<i64: 8, 16>}, {pipeline_mode = #tpu.pipeline_mode<synchronous>, transform_indices = @transform_1, window_bounds = array<i64: 16, 64>}, {pipeline_mode = #tpu.pipeline_mode<synchronous>, transform_indices = @transform_2, window_bounds = array<i64: 1, 64>}, {pipeline_mode = #tpu.pipeline_mode<synchronous>, transform_indices = @transform_3, window_bounds = array<i64: 64, 32>}, {pipeline_mode = #tpu.pipeline_mode<synchronous>, transform_indices = @transform_4, window_bounds = array<i64: 1, 32>}, {pipeline_mode = #tpu.pipeline_mode<synchronous>, transform_indices = @transform_5, window_bounds = array<i64: 32, 4>}, {pipeline_mode = #tpu.pipeline_mode<synchronous>, transform_indices = @transform_6, window_bounds = array<i64: 1, 4>}, {transform_indices = @transform_7, window_bounds = array<i64: 8, 4>}]} {
    %c0 = arith.constant 0 : index
    %c0_0 = arith.constant 0 : index
    %0 = vector.load %arg2[%c0, %c0_0] : memref<16x64xbf16, #tpu.memory_space<vmem>>, vector<16x64xbf16>
    %c0_1 = arith.constant 0 : index
    %c0_2 = arith.constant 0 : index
    %1 = vector.load %arg3[%c0_1, %c0_2] : memref<1x64xf32, #tpu.memory_space<vmem>>, vector<1x64xf32>
    %c0_3 = arith.constant 0 : index
    %c0_4 = arith.constant 0 : index
    %2 = vector.load %arg4[%c0_3, %c0_4] : memref<64x32xbf16, #tpu.memory_space<vmem>>, vector<64x32xbf16>
    %c0_5 = arith.constant 0 : index
    %c0_6 = arith.constant 0 : index
    %3 = vector.load %arg5[%c0_5, %c0_6] : memref<1x32xf32, #tpu.memory_space<vmem>>, vector<1x32xf32>
    %c0_7 = arith.constant 0 : index
    %c0_8 = arith.constant 0 : index
    %4 = vector.load %arg6[%c0_7, %c0_8] : memref<32x4xbf16, #tpu.memory_space<vmem>>, vector<32x4xbf16>
    %c0_9 = arith.constant 0 : index
    %c0_10 = arith.constant 0 : index
    %5 = vector.load %arg7[%c0_9, %c0_10] : memref<1x4xf32, #tpu.memory_space<vmem>>, vector<1x4xf32>
    %c0_i32 = arith.constant 0 : i32
    %c8_i32 = arith.constant 8 : i32
    %6 = arith.muli %c0_i32, %c8_i32 : i32
    %7 = tpu.assume_multiple %6, 8 : i32
    %8 = arith.index_cast %7 : i32 to index
    %c0_11 = arith.constant 0 : index
    %9 = vector.load %arg1[%8, %c0_11] : memref<8x16xf32, #tpu.memory_space<vmem>>, vector<8x16xf32>
    %10 = arith.truncf %9 : vector<8x16xf32> to vector<8x16xbf16>
    %cst = arith.constant dense<0.000000e+00> : vector<8x64xf32>
    %11 = tpu.matmul %10, %0, %cst {dimension_numbers = #tpu.dot_dimension_numbers<[1], [0], [0], [1], [0, 0, 1, 1], [], []>} : vector<8x16xbf16>, vector<16x64xbf16>, vector<8x64xf32> -> vector<8x64xf32>
    %12 = vector.broadcast %1 : vector<1x64xf32> to vector<8x64xf32>
    %13 = arith.addf %11, %12 : vector<8x64xf32>
    %cst_12 = arith.constant 0.000000e+00 : f32
    %14 = vector.broadcast %cst_12 : f32 to vector<8x64xf32>
    %15 = arith.maximumf %13, %14 : vector<8x64xf32>
    %16 = arith.truncf %15 : vector<8x64xf32> to vector<8x64xbf16>
    %cst_13 = arith.constant dense<0.000000e+00> : vector<8x32xf32>
    %17 = tpu.matmul %16, %2, %cst_13 {dimension_numbers = #tpu.dot_dimension_numbers<[1], [0], [0], [1], [0, 0, 1, 1], [], []>} : vector<8x64xbf16>, vector<64x32xbf16>, vector<8x32xf32> -> vector<8x32xf32>
    %18 = vector.broadcast %3 : vector<1x32xf32> to vector<8x32xf32>
    %19 = arith.addf %17, %18 : vector<8x32xf32>
    %cst_14 = arith.constant 0.000000e+00 : f32
    %20 = vector.broadcast %cst_14 : f32 to vector<8x32xf32>
    %21 = arith.maximumf %19, %20 : vector<8x32xf32>
    %22 = arith.truncf %21 : vector<8x32xf32> to vector<8x32xbf16>
    %cst_15 = arith.constant dense<0.000000e+00> : vector<8x4xf32>
    %23 = tpu.matmul %22, %4, %cst_15 {dimension_numbers = #tpu.dot_dimension_numbers<[1], [0], [0], [1], [0, 0, 1, 1], [], []>} : vector<8x32xbf16>, vector<32x4xbf16>, vector<8x4xf32> -> vector<8x4xf32>
    %24 = vector.broadcast %5 : vector<1x4xf32> to vector<8x4xf32>
    %25 = arith.addf %23, %24 : vector<8x4xf32>
    %26 = arith.index_cast %7 : i32 to index
    %c0_16 = arith.constant 0 : index
    %27 = vector.load %arg8[%26, %c0_16] : memref<8x4xf32, #tpu.memory_space<vmem>>, vector<8x4xf32>
    tpu.vector_store %arg8[%26, %c0_16], %25 {strides = array<i32>} : memref<8x4xf32, #tpu.memory_space<vmem>>, vector<8x4xf32>,
    %c1_i32 = arith.constant 1 : i32
    return
  }
  func.func @transform_0(%arg0: i32) -> (i32, i32) {
    %c0_i32 = arith.constant 0 : i32
    %c0_i32_0 = arith.constant 0 : i32
    return %arg0, %c0_i32 : i32, i32
  }
  func.func @transform_1(%arg0: i32) -> (i32, i32) {
    %c0_i32 = arith.constant 0 : i32
    %c0_i32_0 = arith.constant 0 : i32
    %c0_i32_1 = arith.constant 0 : i32
    return %c0_i32, %c0_i32_0 : i32, i32
  }
  func.func @transform_2(%arg0: i32) -> (i32, i32) {
    %c0_i32 = arith.constant 0 : i32
    %c0_i32_0 = arith.constant 0 : i32
    %c0_i32_1 = arith.constant 0 : i32
    return %c0_i32, %c0_i32_0 : i32, i32
  }
  func.func @transform_3(%arg0: i32) -> (i32, i32) {
    %c0_i32 = arith.constant 0 : i32
    %c0_i32_0 = arith.constant 0 : i32
    %c0_i32_1 = arith.constant 0 : i32
    return %c0_i32, %c0_i32_0 : i32, i32
  }
  func.func @transform_4(%arg0: i32) -> (i32, i32) {
    %c0_i32 = arith.constant 0 : i32
    %c0_i32_0 = arith.constant 0 : i32
    %c0_i32_1 = arith.constant 0 : i32
    return %c0_i32, %c0_i32_0 : i32, i32
  }
  func.func @transform_5(%arg0: i32) -> (i32, i32) {
    %c0_i32 = arith.constant 0 : i32
    %c0_i32_0 = arith.constant 0 : i32
    %c0_i32_1 = arith.constant 0 : i32
    return %c0_i32, %c0_i32_0 : i32, i32
  }
  func.func @transform_6(%arg0: i32) -> (i32, i32) {
    %c0_i32 = arith.constant 0 : i32
    %c0_i32_0 = arith.constant 0 : i32
    %c0_i32_1 = arith.constant 0 : i32
    return %c0_i32, %c0_i32_0 : i32, i32
  }
  func.func @transform_7(%arg0: i32) -> (i32, i32) {
    %c0_i32 = arith.constant 0 : i32
    %c0_i32_0 = arith.constant 0 : i32
    return %arg0, %c0_i32 : i32, i32
  }
}

</mosaic_0001>

<bundles_post_ra>
// kernel: feedforward_nn.1
= control target key start
LH: loop header
LB: loop body
LE: loop exit
PB: predicated region body
PF: predicated region fallthrough
CT: control target
= control target key end

     0   :  { %v306_v0 = vmov 0.0   ;;  %vm307_vm0 = vmmov 0   ;;  %vm58_vm1 = vcmask 130048   ;;  %vm134_vm2 = vcmask 523264   ;;  %s384_s1 = inlined_call_operand.vmem [shape: bf16[16,64], index: 1, kind: input, shape index: {}]   ;;  %s385_s0 = inlined_call_operand.vmem [shape: f32[8,16], index: 0, kind: input, shape index: {}]   ;;  %s386_s3 = inlined_call_operand.vmem [shape: bf16[64,32], index: 3, kind: input, shape index: {}]   ;;  %s387_s5 = inlined_call_operand.vmem [shape: bf16[32,4], index: 5, kind: input, shape index: {}]   ;;  %s388_s2 = inlined_call_operand.vmem [shape: f32[1,64], index: 2, kind: input, shape index: {}]   ;;  %s389_s4 = inlined_call_operand.vmem [shape: f32[1,32], index: 4, kind: input, shape index: {}]   ;;  %s390_s6 = inlined_call_operand.vmem [shape: f32[1,4], index: 6, kind: input, shape index: {}]   ;;  %s391_s7 = inlined_call_operand.vmem [shape: f32[8,4], index: 7, kind: output, shape index: {}]  }
   0x1   :  { %271 = vmatprep.subr.bf16.mxu0 %v306_v0  ;;  %v299_v1 = vld [vmem:[%s384_s1] sm:$0xff]   ;;  %273 = vmatprep.mubr.msk.bf16.mxu0 %vm307_vm0, %v306_v0  ;;  %v301_v5 = vld [vmem:[%s386_s3 + $0x8] sm:$0xff]   ;;  %v302_v6 = vld [vmem:[%s386_s3 + $0x10] sm:$0xff]   ;;  %vm198_vm3 = vcmask 261120   ;;  %vm242_vm4 = vcmask 31744  }
   0x2   :  { %v44_v2 = vld [vmem:[%s385_s0] sm:$0xff]  ;;  %277 = vmatprep.subr.bf16.mxu1 %v306_v0  ;;  %285 = vmatprep.mubr.msk.bf16.mxu1 %vm307_vm0, %v306_v0  ;;  %v303_v7 = vld [vmem:[%s386_s3 + $0x18] sm:$0xff]   ;;  %v305_v17 = vld [vmem:[%s387_s5 + $0x8] sm:$0xff]  }
   0x3   :  { %272 = vmatpush3.bf16.msra.mxu0 %v299_v1  ;;  %v45_v3 = vpack.c.bf16 %v44_v2, %v44_v2  ;;  %v300_v4 = vld [vmem:[%s386_s3] sm:$0xff]  }
   0x4   :  { %289 = vmatprep.subr.bf16.mxu0 %v306_v0  ;;  %278 = vmatpush3.bf16.msra.mxu1 %v300_v4  ;;  %v304_v8 = vld [vmem:[%s387_s5] sm:$0xff]  }
   0x5   :  { %279 = vmatprep.subr.bf16.mxu1 %v306_v0  ;;  %v248_v9 = vld [vmem:[%s388_s2] ss:$0 sm:$0xff] }
   0x6   :  { %274 = vmatmul.mubr.msk.bf16.vlgmr.msra.gmra.mrb[0].mxu0 %vm58_vm1, %v45_v3  ;;  %v251_v18 = vld [vmem:[%s389_s4] ss:$0 sm:$0xff] }
   0x7   :  { %293 = vmatprep.mubr.msk.bf16.mxu0 %vm307_vm0, %v306_v0  ;;  %290 = vmatpush3.bf16.msra.mxu0 %v304_v8  ;;  %v257_v26 = vld [vmem:[%s390_s6] ss:$0 sm:$0xff] }
   0x8   :  { %280 = vmatpush3.bf16.msra.mxu1 %v301_v5  ;;  %291 = vmatprep.subr.bf16.mxu0 %v306_v0 }
   0x9   :  { %281 = vmatprep.subr.bf16.mxu1 %v306_v0 }
   0xb   :  { %292 = vmatpush3.bf16.msra.mxu0 %v305_v17 }
   0xc   :  { %282 = vmatpush3.bf16.msra.mxu1 %v302_v6 }
   0xd   :  { %283 = vmatprep.subr.bf16.mxu1 %v306_v0 }
  0x10   :  { %284 = vmatpush3.bf16.msra.mxu1 %v303_v7 }
  0xd9   :  { %v96_v10 = vpop.f32.mrb[0].mxu0 }
  0xda   :  { %v97_v11 = vadd.f32 %v248_v9, %v96_v10  ;;  %v275_v12 = vpop.f32.mrb[1].mxu0 }
  0xdb   :  { %v99_v13 = vpop.f32.mrb[2].mxu0 }
  0xdc   :  { %v102_v14 = vmax.f32 %v97_v11, 0.0  ;;  %v276_v15 = vpop.f32.mrb[3].mxu0 }
  0xde   :  { %v103_v16 = vpack.c.bf16 %v102_v14, %v102_v14 }
  0xe0   :  { %286 = vmatmul.mubr.msk.bf16.vlgmr.msra.gmra.mrb[0].mxu1 %vm134_vm2, %v103_v16 }
 0x1b3   :  { %v172_v19 = vpop.f32.mrb[0].mxu1 }
 0x1b4   :  { %v173_v20 = vadd.f32 %v251_v18, %v172_v19  ;;  %v287_v21 = vpop.f32.mrb[1].mxu1 }
 0x1b5   :  { %v175_v22 = vpop.f32.mrb[2].mxu1 }
 0x1b6   :  { %v178_v23 = vmax.f32 %v173_v20, 0.0  ;;  %v288_v24 = vpop.f32.mrb[3].mxu1 }
 0x1b8   :  { %v179_v25 = vpack.c.bf16 %v178_v23, %v178_v23 }
 0x1ba   :  { %294 = vmatmul.mubr.msk.bf16.vlgmr.msra.gmra.mrb[4].mxu0 %vm198_vm3, %v179_v25 }
 0x28d   :  { %v236_v27 = vpop.f32.mrb[4].mxu0 }
 0x28e   :  { %v237_v28 = vadd.f32 %v257_v26, %v236_v27  ;;  %v295_v29 = vpop.f32.mrb[5].mxu0 }
 0x28f   :  { %v239_v30 = vpop.f32.mrb[6].mxu0 }
 0x290   :  { %243 = vst.msk [vmem:[%s391_s7] sm:$0xff] %vm242_vm4, %v237_v28  ;;  %v296_v31 = vpop.f32.mrb[7].mxu0 }

</bundles_post_ra>
